<compile_context>
chip_gen: v7x
topology: tpu7x:2x2x1
jax: 0.10.0
libtpu: 0.0.40
codegen_flags: <defaults>
</compile_context>

<pallas_src>
import functools
import math

import jax
import jax.numpy as jnp
from jax import lax
from jax.experimental import pallas as pl
from jax.experimental.pallas import tpu as pltpu


# HW-tile rows per grid step (per batch element). Small here so the test
# shapes (HW=256) still exercise the accumulation path; raise for larger
# images, keeping the double-buffered patch tile + f32 activation tile well
# under v7x's 64 MiB physical VMEM.
_HW_TILE_TARGET = 128


# ----------------------------------------------------------------------------
# Fused Pallas kernel: conv-matmul (+bias) -> ReLU -> pooled accumulate
#                      -> (final tile) projection head
# ----------------------------------------------------------------------------
def fused_kernel(patches_ref, wconv_ref, wstack_ref, bn_ref, out_ref, acc_ref,
                 *, batch, inv_hw):
    """Grid = (view, hw_tile). One step = conv matmul on one HW tile of one
    view + partial global-average-pool accumulate; the projection head runs
    only on the final HW tile of each view.

    patches_ref: (1, B, THW, Kb) bf16   im2col patches + trailing ones-lane
    wconv_ref  : (Kb, D)         bf16   conv weight; last row = conv bias
    wstack_ref : (3, D, D)       f32    [w1, w2, w3], zero-padded
    bn_ref     : (8, D)          f32    [b1, g1, be1, b2, g2, be2, 0, 0]
    out_ref    : (1, Bp, D)      f32
    acc_ref    : (Bp, D)         f32    pooled-feature accumulator (scratch)
    """
    t = pl.program_id(1)
    _, b, thw, kb = patches_ref.shape
    bp, d = acc_ref.shape

    @pl.when(t == 0)
    def _init():
        acc_ref[...] = jnp.zeros_like(acc_ref)

    # Conv(3x3, pad=1) + bias as ONE lane-dense bf16 MXU matmul over all
    # B*THW pixel rows of this tile (the bias rides in the trailing ones-lane
    # of K, so no f32 bias-add pass over the activation is needed).
    p2d = patches_ref[0].reshape(b * thw, kb)
    act = jnp.dot(p2d, wconv_ref[...], preferred_element_type=jnp.float32)
    act = jnp.maximum(act, 0.0)                                # ReLU, f32

    # Partial global average pool: per-batch f32 sum over this HW tile (VPU).
    part = jnp.sum(act.reshape(b, thw, d), axis=1)             # (B, D) f32
    acc_ref[0:b, :] += part

    # Projection head only on the final HW tile of this view.
    @pl.when(t == pl.num_programs(1) - 1)
    def _finalize():
        eps = 1e-5
        inv_b = 1.0 / batch
        feat = acc_ref[...] * inv_hw                           # (Bp, D) f32

        def lin_bn_relu(x, w, bias, gamma, beta):
            y = jnp.dot(x, w, preferred_element_type=jnp.float32) + bias
            # Two-pass BatchNorm statistics over the REAL batch rows only
            # (padded rows carry the bias and must not pollute the stats).
            yb = y[0:batch]
            mu = jnp.sum(yb, axis=0, keepdims=True) * inv_b
            dlt = yb - mu
            var = jnp.sum(dlt * dlt, axis=0, keepdims=True) * inv_b
            yhat = (y - mu) * lax.rsqrt(var + eps)
            return jnp.maximum(yhat * gamma + beta, 0.0)

        h = lin_bn_relu(feat, wstack_ref[0],
                        bn_ref[0:1], bn_ref[1:2], bn_ref[2:3])
        h = lin_bn_relu(h, wstack_ref[1],
                        bn_ref[3:4], bn_ref[4:5], bn_ref[5:6])
        out_ref[0] = jnp.dot(h, wstack_ref[2],
                             preferred_element_type=jnp.float32)


# ----------------------------------------------------------------------------
# pallas_call wrapper
# ----------------------------------------------------------------------------
def _pick_hw_tile(hw, target=_HW_TILE_TARGET):
    if hw <= target:
        return hw
    for cand in range(min(target, hw), 7, -1):
        if cand % 8 == 0 and hw % cand == 0:
            return cand
    return hw                       # block dim == full dim is always legal


def _full_spec(a):
    n = a.ndim
    return pl.BlockSpec(a.shape, lambda v, t: (0,) * n)


def barlow_fused_call(patches, params):
    V, B, HW, Kb = patches.shape
    wconv, wstack, bnrow = params["wconv"], params["wstack"], params["bnrow"]
    D = wstack.shape[-1]
    Bp = ((B + 7) // 8) * 8          # sublane-full output rows (sliced later)
    thw = _pick_hw_tile(HW)
    kern = functools.partial(fused_kernel, batch=B, inv_hw=1.0 / HW)
    return pl.pallas_call(
        kern,
        out_shape=jax.ShapeDtypeStruct((V, Bp, D), jnp.float32),
        grid_spec=pltpu.PrefetchScalarGridSpec(
            num_scalar_prefetch=0,
            grid=(V, HW // thw),     # HW reduction axis last
            in_specs=[
                pl.BlockSpec((1, B, thw, Kb), lambda v, t: (v, 0, t, 0)),
                _full_spec(wconv),
                _full_spec(wstack),
                _full_spec(bnrow),
            ],
            out_specs=pl.BlockSpec((1, Bp, D), lambda v, t: (v, 0, 0)),
            scratch_shapes=[pltpu.VMEM((Bp, D), jnp.float32)],
        ),
        compiler_params=pltpu.CompilerParams(
            dimension_semantics=("parallel", "arbitrary"),
            vmem_limit_bytes=32 * 1024 * 1024),
    )(patches, wconv, wstack, bnrow)


# ----------------------------------------------------------------------------
# JAX glue: im2col (+ bias lane), parameter init (packed, padded), forward
# ----------------------------------------------------------------------------
def im2col_3x3(x):
    """x: (B, C, H, W) NCHW -> patches (B, H*W, C*9), PyTorch weight ordering."""
    B, C, H, W = x.shape
    xp = jnp.pad(x, ((0, 0), (0, 0), (1, 1), (1, 1)))
    cols = []
    for dy in range(3):
        for dx in range(3):
            cols.append(xp[:, :, dy:dy + H, dx:dx + W])
    patches = jnp.stack(cols, axis=1)            # (B, 9, C, H, W)
    patches = patches.transpose(0, 3, 4, 2, 1)   # (B, H, W, C, 9)
    return patches.reshape(B, H * W, C * 9)


def _make_inputs(x):
    """im2col + trailing ones-lane (carries conv bias); bf16 (V, B, HW, Kb)."""
    patches = jax.vmap(im2col_3x3)(x)                          # (V, B, HW, C*9)
    ones = jnp.ones(patches.shape[:-1] + (1,), patches.dtype)
    return jnp.concatenate([patches, ones], axis=-1).astype(jnp.bfloat16)


def _round_up_128(n):
    return max(((n + 127) // 128) * 128, 128)


def init_params(key, in_channels, feat_dim, projection_sizes):
    ks = jax.random.split(key, 8)

    def unif(k, shape, fan_in):
        b = 1.0 / math.sqrt(fan_in)
        return jax.random.uniform(k, shape, jnp.float32, -b, b)

    K = in_channels * 9
    Kb = K + 1                                   # trailing row = conv bias
    F_, H1, H2, P = projection_sizes
    assert F_ == feat_dim
    D = _round_up_128(max(F_, H1, H2, P))

    wconv = unif(ks[0], (feat_dim, in_channels, 3, 3), K)   # PyTorch (F,C,3,3)
    bconv = unif(ks[1], (feat_dim,), K)
    w1 = unif(ks[2], (F_, H1), F_); b1 = unif(ks[3], (H1,), F_)
    w2 = unif(ks[4], (H1, H2), H1); b2 = unif(ks[5], (H2,), H1)
    w3 = unif(ks[6], (H2, P), H2)                            # final Linear, no bias

    # Conv weight + bias packed, (Kb, D) bf16: rows 0..K-1 = W^T, row K = bias.
    wc = jnp.zeros((Kb, D), jnp.float32)
    wc = wc.at[:K, :F_].set(wconv.reshape(feat_dim, K).T)
    wc = wc.at[K, :F_].set(bconv)

    # Head weights stacked into one (3, D, D) f32 array (one DMA, f32 fidelity).
    ws = jnp.zeros((3, D, D), jnp.float32)
    ws = ws.at[0, :F_, :H1].set(w1)
    ws = ws.at[1, :H1, :H2].set(w2)
    ws = ws.at[2, :H2, :P].set(w3)

    # Bias / BatchNorm rows packed into one (8, D) f32 array:
    #   [b1, gamma1, beta1, b2, gamma2, beta2, 0, 0].
    bn = jnp.zeros((8, D), jnp.float32)
    bn = bn.at[0, :H1].set(b1)
    bn = bn.at[1, :H1].set(jnp.ones((H1,), jnp.float32))
    bn = bn.at[3, :H2].set(b2)
    bn = bn.at[4, :H2].set(jnp.ones((H2,), jnp.float32))

    return {"wconv": wc.astype(jnp.bfloat16), "wstack": ws, "bnrow": bn}


@functools.partial(jax.jit, static_argnames=("proj_dim",))
def barlow_twin_forward(params, x, *, proj_dim):
    """x: (2, B, C, H, W) -> (proj_feat_x1, proj_feat_x2), each (B, P)."""
    V, B, C, H, W = x.shape
    patches = _make_inputs(x)
    out = barlow_fused_call(patches, params)                   # (V, Bp, D)
    out = out[:, :B, :proj_dim]
    return out[0], out[1]


# ----------------------------------------------------------------------------
# Pure-JAX reference (same quantization / packed params) for validation
# ----------------------------------------------------------------------------
def _lin_bn_relu_ref(x, w, b, g, be):
    y = jnp.dot(x, w, preferred_element_type=jnp.float32) + b
    mu = jnp.mean(y, axis=0, keepdims=True)
    var = jnp.mean((y - mu) ** 2, axis=0, keepdims=True)
    return jnp.maximum((y - mu) * lax.rsqrt(var + 1e-5) * g + be, 0.0)


def reference_forward(params, x, proj_dim):
    V, B, C, H, W = x.shape
    HW = H * W
    patches = _make_inputs(x)                                  # (V, B, HW, Kb)
    outs = []
    for v in range(V):
        p2d = patches[v].reshape(B * HW, -1)
        act = jnp.maximum(
            jnp.dot(p2d, params["wconv"], preferred_element_type=jnp.float32),
            0.0)
        feat = jnp.sum(act.reshape(B, HW, -1), axis=1) / HW    # (B, D) f32
        h = _lin_bn_relu_ref(feat, params["wstack"][0], params["bnrow"][0:1],
                             params["bnrow"][1:2], params["bnrow"][2:3])
        h = _lin_bn_relu_ref(h, params["wstack"][1], params["bnrow"][3:4],
                             params["bnrow"][4:5], params["bnrow"][5:6])
        o = jnp.dot(h, params["wstack"][2], preferred_element_type=jnp.float32)
        outs.append(o[:, :proj_dim])
    return outs[0], outs[1]


# ----------------------------------------------------------------------------
if __name__ == "__main__":
    key = jax.random.PRNGKey(0)
    k_x, k_p = jax.random.split(key)

    # small shapes: 2 views, batch=4, channels=4, 16x16 images,
    # feature_size=32, projection_sizes=[32, 64, 64, 32], projection_dim=32
    V, B, C, H, W = 2, 4, 4, 16, 16
    feat_dim = 32
    projection_sizes = [32, 64, 64, 32]
    proj_dim = projection_sizes[-1]

    x = jax.random.normal(k_x, (V, B, C, H, W), jnp.float32)
    params = init_params(k_p, C, feat_dim, projection_sizes)

    p1, p2 = barlow_twin_forward(params, x, proj_dim=proj_dim)
    jax.block_until_ready((p1, p2))
    assert p1.shape == (B, proj_dim) and p2.shape == (B, proj_dim)
    assert bool(jnp.all(jnp.isfinite(p1))) and bool(jnp.all(jnp.isfinite(p2)))

    r1, r2 = reference_forward(params, x, proj_dim)
    assert float(jnp.max(jnp.abs(p1 - r1))) < 5e-2
    assert float(jnp.max(jnp.abs(p2 - r2))) < 5e-2

    print("KERNEL_OK")
</pallas_src>

<mosaic_0001>
module attributes {stable_mosaic.version = 11 : i64} {
  func.func @fused_kernel(%arg0: i32, %arg1: i32, %arg2: memref<1x4x128x37xbf16, #tpu.memory_space<vmem>>, %arg3: memref<37x128xbf16, #tpu.memory_space<vmem>>, %arg4: memref<3x128x128xf32, #tpu.memory_space<vmem>>, %arg5: memref<8x128xf32, #tpu.memory_space<vmem>>, %arg6: memref<1x8x128xf32, #tpu.memory_space<vmem>>, %arg7: memref<8x128xf32, #tpu.memory_space<vmem>>) attributes {dimension_semantics = [#tpu.dimension_semantics<parallel>, #tpu.dimension_semantics<arbitrary>], iteration_bounds = array<i64: 2, 2>, scalar_prefetch = 0 : i64, scratch_operands = 1 : i64, tpu.core_type = #tpu.core_type<tc>, window_params = [{transform_indices = @transform_0, window_bounds = array<i64: 1, 4, 128, 37>}, {pipeline_mode = #tpu.pipeline_mode<synchronous>, transform_indices = @transform_1, window_bounds = array<i64: 37, 128>}, {pipeline_mode = #tpu.pipeline_mode<synchronous>, transform_indices = @transform_2, window_bounds = array<i64: 3, 128, 128>}, {pipeline_mode = #tpu.pipeline_mode<synchronous>, transform_indices = @transform_3, window_bounds = array<i64: 8, 128>}, {transform_indices = @transform_4, window_bounds = array<i64: 1, 8, 128>}]} {
    %c0_i32 = arith.constant 0 : i32
    %0 = arith.cmpi eq, %arg1, %c0_i32 : i32
    %1 = arith.extui %0 : i1 to i32
    %c0_i32_0 = arith.constant 0 : i32
    %2 = arith.cmpi ne, %1, %c0_i32_0 : i32
    scf.if %2 {
      %cst_13 = arith.constant 0.000000e+00 : f32
      %18 = vector.broadcast %cst_13 : f32 to vector<8x128xf32>
      %c0_14 = arith.constant 0 : index
      %c0_15 = arith.constant 0 : index
      %19 = vector.load %arg7[%c0_14, %c0_15] : memref<8x128xf32, #tpu.memory_space<vmem>>, vector<8x128xf32>
      tpu.vector_store %arg7[%c0_14, %c0_15], %18 {strides = array<i32>} : memref<8x128xf32, #tpu.memory_space<vmem>>, vector<8x128xf32>,
    } else {
    }
    %c0 = arith.constant 0 : index
    %c0_1 = arith.constant 0 : index
    %c0_2 = arith.constant 0 : index
    %c0_3 = arith.constant 0 : index
    %3 = vector.load %arg2[%c0, %c0_1, %c0_2, %c0_3] : memref<1x4x128x37xbf16, #tpu.memory_space<vmem>>, vector<1x4x128x37xbf16>
    %4 = vector.shape_cast %3 : vector<1x4x128x37xbf16> to vector<4x128x37xbf16>
    %5 = vector.shape_cast %4 : vector<4x128x37xbf16> to vector<512x37xbf16>
    %c0_4 = arith.constant 0 : index
    %c0_5 = arith.constant 0 : index
    %6 = vector.load %arg3[%c0_4, %c0_5] : memref<37x128xbf16, #tpu.memory_space<vmem>>, vector<37x128xbf16>
    %cst = arith.constant dense<0.000000e+00> : vector<512x128xf32>
    %7 = tpu.matmul %5, %6, %cst {dimension_numbers = #tpu.dot_dimension_numbers<[1], [0], [0], [1], [0, 0, 1, 1], [], []>} : vector<512x37xbf16>, vector<37x128xbf16>, vector<512x128xf32> -> vector<512x128xf32>
    %cst_6 = arith.constant 0.000000e+00 : f32
    %8 = vector.broadcast %cst_6 : f32 to vector<512x128xf32>
    %9 = arith.maximumf %7, %8 : vector<512x128xf32>
    %10 = vector.shape_cast %9 : vector<512x128xf32> to vector<4x128x128xf32>
    %cst_7 = arith.constant dense<0.000000e+00> : vector<4x128xf32>
    %11 = vector.multi_reduction <add>, %10, %cst_7 [1] : vector<4x128x128xf32> to vector<4x128xf32>
    %c0_8 = arith.constant 0 : index
    %c0_9 = arith.constant 0 : index
    %12 = vector.load %arg7[%c0_8, %c0_9] : memref<8x128xf32, #tpu.memory_space<vmem>>, vector<4x128xf32>
    %13 = arith.addf %12, %11 : vector<4x128xf32>
    %c0_10 = arith.constant 0 : index
    %c0_11 = arith.constant 0 : index
    %14 = vector.load %arg7[%c0_10, %c0_11] : memref<8x128xf32, #tpu.memory_space<vmem>>, vector<4x128xf32>
    tpu.vector_store %arg7[%c0_10, %c0_11], %13 {strides = array<i32>} : memref<8x128xf32, #tpu.memory_space<vmem>>, vector<4x128xf32>,
    %c1_i32 = arith.constant 1 : i32
    %15 = arith.cmpi eq, %arg1, %c1_i32 : i32
    %16 = arith.extui %15 : i1 to i32
    %c0_i32_12 = arith.constant 0 : i32
    %17 = arith.cmpi ne, %16, %c0_i32_12 : i32
    scf.if %17 {
      %c0_13 = arith.constant 0 : index
      %c0_14 = arith.constant 0 : index
      %18 = vector.load %arg7[%c0_13, %c0_14] : memref<8x128xf32, #tpu.memory_space<vmem>>, vector<8x128xf32>
      %cst_15 = arith.constant 3.906250e-03 : f32
      %19 = vector.broadcast %cst_15 : f32 to vector<8x128xf32>
      %20 = arith.mulf %18, %19 : vector<8x128xf32>
      %c0_16 = arith.constant 0 : index
      %c0_17 = arith.constant 0 : index
      %c0_18 = arith.constant 0 : index
      %21 = vector.load %arg4[%c0_16, %c0_17, %c0_18] : memref<3x128x128xf32, #tpu.memory_space<vmem>>, vector<1x128x128xf32>
      %22 = vector.shape_cast %21 : vector<1x128x128xf32> to vector<128x128xf32>
      %c0_19 = arith.constant 0 : index
      %c0_20 = arith.constant 0 : index
      %23 = vector.load %arg5[%c0_19, %c0_20] : memref<8x128xf32, #tpu.memory_space<vmem>>, vector<1x128xf32>
      %c1 = arith.constant 1 : index
      %c0_21 = arith.constant 0 : index
      %24 = vector.load %arg5[%c1, %c0_21] : memref<8x128xf32, #tpu.memory_space<vmem>>, vector<1x128xf32>
      %c2 = arith.constant 2 : index
      %c0_22 = arith.constant 0 : index
      %25 = vector.load %arg5[%c2, %c0_22] : memref<8x128xf32, #tpu.memory_space<vmem>>, vector<1x128xf32>
      %cst_23 = arith.constant dense<0.000000e+00> : vector<8x128xf32>
      %26 = tpu.matmul %20, %22, %cst_23 {dimension_numbers = #tpu.dot_dimension_numbers<[1], [0], [0], [1], [0, 0, 1, 1], [], []>} : vector<8x128xf32>, vector<128x128xf32>, vector<8x128xf32> -> vector<8x128xf32>
      %27 = vector.broadcast %23 : vector<1x128xf32> to vector<8x128xf32>
      %28 = arith.addf %26, %27 : vector<8x128xf32>
      %29 = vector.extract_strided_slice %28 {offsets = [0, 0], sizes = [4, 128], strides = [1, 1]} : vector<8x128xf32> to vector<4x128xf32>
      %cst_24 = arith.constant dense<0.000000e+00> : vector<128xf32>
      %30 = vector.multi_reduction <add>, %29, %cst_24 [0] : vector<4x128xf32> to vector<128xf32>
      %31 = vector.shape_cast %30 : vector<128xf32> to vector<1x128xf32>
      %cst_25 = arith.constant 2.500000e-01 : f32
      %32 = vector.broadcast %cst_25 : f32 to vector<1x128xf32>
      %33 = arith.mulf %31, %32 : vector<1x128xf32>
      %34 = vector.broadcast %33 : vector<1x128xf32> to vector<4x128xf32>
      %35 = arith.subf %29, %34 : vector<4x128xf32>
      %36 = arith.mulf %35, %35 : vector<4x128xf32>
      %cst_26 = arith.constant dense<0.000000e+00> : vector<128xf32>
      %37 = vector.multi_reduction <add>, %36, %cst_26 [0] : vector<4x128xf32> to vector<128xf32>
      %38 = vector.shape_cast %37 : vector<128xf32> to vector<1x128xf32>
      %cst_27 = arith.constant 2.500000e-01 : f32
      %39 = vector.broadcast %cst_27 : f32 to vector<1x128xf32>
      %40 = arith.mulf %38, %39 : vector<1x128xf32>
      %41 = vector.broadcast %33 : vector<1x128xf32> to vector<8x128xf32>
      %42 = arith.subf %28, %41 : vector<8x128xf32>
      %cst_28 = arith.constant 9.99999974E-6 : f32
      %43 = vector.broadcast %cst_28 : f32 to vector<1x128xf32>
      %44 = arith.addf %40, %43 : vector<1x128xf32>
      %45 = math.rsqrt %44 : vector<1x128xf32>
      %46 = vector.broadcast %45 : vector<1x128xf32> to vector<8x128xf32>
      %47 = arith.mulf %42, %46 : vector<8x128xf32>
      %48 = vector.broadcast %24 : vector<1x128xf32> to vector<8x128xf32>
      %49 = arith.mulf %47, %48 : vector<8x128xf32>
      %50 = vector.broadcast %25 : vector<1x128xf32> to vector<8x128xf32>
      %51 = arith.addf %49, %50 : vector<8x128xf32>
      %cst_29 = arith.constant 0.000000e+00 : f32
      %52 = vector.broadcast %cst_29 : f32 to vector<8x128xf32>
      %53 = arith.maximumf %51, %52 : vector<8x128xf32>
      %c1_30 = arith.constant 1 : index
      %c0_31 = arith.constant 0 : index
      %c0_32 = arith.constant 0 : index
      %54 = vector.load %arg4[%c1_30, %c0_31, %c0_32] : memref<3x128x128xf32, #tpu.memory_space<vmem>>, vector<1x128x128xf32>
      %55 = vector.shape_cast %54 : vector<1x128x128xf32> to vector<128x128xf32>
      %c3 = arith.constant 3 : index
      %c0_33 = arith.constant 0 : index
      %56 = vector.load %arg5[%c3, %c0_33] : memref<8x128xf32, #tpu.memory_space<vmem>>, vector<1x128xf32>
      %c4 = arith.constant 4 : index
      %c0_34 = arith.constant 0 : index
      %57 = vector.load %arg5[%c4, %c0_34] : memref<8x128xf32, #tpu.memory_space<vmem>>, vector<1x128xf32>
      %c5 = arith.constant 5 : index
      %c0_35 = arith.constant 0 : index
      %58 = vector.load %arg5[%c5, %c0_35] : memref<8x128xf32, #tpu.memory_space<vmem>>, vector<1x128xf32>
      %cst_36 = arith.constant dense<0.000000e+00> : vector<8x128xf32>
      %59 = tpu.matmul %53, %55, %cst_36 {dimension_numbers = #tpu.dot_dimension_numbers<[1], [0], [0], [1], [0, 0, 1, 1], [], []>} : vector<8x128xf32>, vector<128x128xf32>, vector<8x128xf32> -> vector<8x128xf32>
      %60 = vector.broadcast %56 : vector<1x128xf32> to vector<8x128xf32>
      %61 = arith.addf %59, %60 : vector<8x128xf32>
      %62 = vector.extract_strided_slice %61 {offsets = [0, 0], sizes = [4, 128], strides = [1, 1]} : vector<8x128xf32> to vector<4x128xf32>
      %cst_37 = arith.constant dense<0.000000e+00> : vector<128xf32>
      %63 = vector.multi_reduction <add>, %62, %cst_37 [0] : vector<4x128xf32> to vector<128xf32>
      %64 = vector.shape_cast %63 : vector<128xf32> to vector<1x128xf32>
      %cst_38 = arith.constant 2.500000e-01 : f32
      %65 = vector.broadcast %cst_38 : f32 to vector<1x128xf32>
      %66 = arith.mulf %64, %65 : vector<1x128xf32>
      %67 = vector.broadcast %66 : vector<1x128xf32> to vector<4x128xf32>
      %68 = arith.subf %62, %67 : vector<4x128xf32>
      %69 = arith.mulf %68, %68 : vector<4x128xf32>
      %cst_39 = arith.constant dense<0.000000e+00> : vector<128xf32>
      %70 = vector.multi_reduction <add>, %69, %cst_39 [0] : vector<4x128xf32> to vector<128xf32>
      %71 = vector.shape_cast %70 : vector<128xf32> to vector<1x128xf32>
      %cst_40 = arith.constant 2.500000e-01 : f32
      %72 = vector.broadcast %cst_40 : f32 to vector<1x128xf32>
      %73 = arith.mulf %71, %72 : vector<1x128xf32>
      %74 = vector.broadcast %66 : vector<1x128xf32> to vector<8x128xf32>
      %75 = arith.subf %61, %74 : vector<8x128xf32>
      %cst_41 = arith.constant 9.99999974E-6 : f32
      %76 = vector.broadcast %cst_41 : f32 to vector<1x128xf32>
      %77 = arith.addf %73, %76 : vector<1x128xf32>
      %78 = math.rsqrt %77 : vector<1x128xf32>
      %79 = vector.broadcast %78 : vector<1x128xf32> to vector<8x128xf32>
      %80 = arith.mulf %75, %79 : vector<8x128xf32>
      %81 = vector.broadcast %57 : vector<1x128xf32> to vector<8x128xf32>
      %82 = arith.mulf %80, %81 : vector<8x128xf32>
      %83 = vector.broadcast %58 : vector<1x128xf32> to vector<8x128xf32>
      %84 = arith.addf %82, %83 : vector<8x128xf32>
      %cst_42 = arith.constant 0.000000e+00 : f32
      %85 = vector.broadcast %cst_42 : f32 to vector<8x128xf32>
      %86 = arith.maximumf %84, %85 : vector<8x128xf32>
      %c2_43 = arith.constant 2 : index
      %c0_44 = arith.constant 0 : index
      %c0_45 = arith.constant 0 : index
      %87 = vector.load %arg4[%c2_43, %c0_44, %c0_45] : memref<3x128x128xf32, #tpu.memory_space<vmem>>, vector<1x128x128xf32>
      %88 = vector.shape_cast %87 : vector<1x128x128xf32> to vector<128x128xf32>
      %cst_46 = arith.constant dense<0.000000e+00> : vector<8x128xf32>
      %89 = tpu.matmul %86, %88, %cst_46 {dimension_numbers = #tpu.dot_dimension_numbers<[1], [0], [0], [1], [0, 0, 1, 1], [], []>} : vector<8x128xf32>, vector<128x128xf32>, vector<8x128xf32> -> vector<8x128xf32>
      %c0_47 = arith.constant 0 : index
      %c0_48 = arith.constant 0 : index
      %c0_49 = arith.constant 0 : index
      %90 = vector.load %arg6[%c0_47, %c0_48, %c0_49] : memref<1x8x128xf32, #tpu.memory_space<vmem>>, vector<1x8x128xf32>
      %91 = vector.shape_cast %90 : vector<1x8x128xf32> to vector<8x128xf32>
      %92 = vector.shape_cast %89 : vector<8x128xf32> to vector<1x8x128xf32>
      tpu.vector_store %arg6[%c0_47, %c0_48, %c0_49], %92 {strides = array<i32>} : memref<1x8x128xf32, #tpu.memory_space<vmem>>, vector<1x8x128xf32>,
    } else {
    }
    return
  }
  func.func @transform_0(%arg0: i32, %arg1: i32) -> (i32, i32, i32, i32) {
    %c0_i32 = arith.constant 0 : i32
    %c0_i32_0 = arith.constant 0 : i32
    %c0_i32_1 = arith.constant 0 : i32
    return %arg0, %c0_i32, %arg1, %c0_i32_0 : i32, i32, i32, i32
  }
  func.func @transform_1(%arg0: i32, %arg1: i32) -> (i32, i32) {
    %c0_i32 = arith.constant 0 : i32
    %c0_i32_0 = arith.constant 0 : i32
    %c0_i32_1 = arith.constant 0 : i32
    return %c0_i32, %c0_i32_0 : i32, i32
  }
  func.func @transform_2(%arg0: i32, %arg1: i32) -> (i32, i32, i32) {
    %c0_i32 = arith.constant 0 : i32
    %c0_i32_0 = arith.constant 0 : i32
    %c0_i32_1 = arith.constant 0 : i32
    %c0_i32_2 = arith.constant 0 : i32
    return %c0_i32, %c0_i32_0, %c0_i32_1 : i32, i32, i32
  }
  func.func @transform_3(%arg0: i32, %arg1: i32) -> (i32, i32) {
    %c0_i32 = arith.constant 0 : i32
    %c0_i32_0 = arith.constant 0 : i32
    %c0_i32_1 = arith.constant 0 : i32
    return %c0_i32, %c0_i32_0 : i32, i32
  }
  func.func @transform_4(%arg0: i32, %arg1: i32) -> (i32, i32, i32) {
    %c0_i32 = arith.constant 0 : i32
    %c0_i32_0 = arith.constant 0 : i32
    %c0_i32_1 = arith.constant 0 : i32
    return %arg0, %c0_i32, %c0_i32_0 : i32, i32, i32
  }
}

</mosaic_0001>

<bundles_post_ra>
// kernel: barlow_twin_forward.1
= control target key start
LH: loop header
LB: loop body
LE: loop exit
PB: predicated region body
PF: predicated region fallthrough
CT: control target
= control target key end

     0   :  { %s2376_s15 = smov 0   ;;  %s2378_s16 = smov 0   ;;  %s2814_s0 = inlined_call_operand.vmem [shape: bf16[2,4,256,37], index: 0, kind: input, shape index: {}]   ;;  %s2815_s1 = inlined_call_operand.vmem [shape: bf16[37,128], index: 1, kind: input, shape index: {}]   ;;  %s2816_s2 = inlined_call_operand.vmem [shape: f32[3,128,128], index: 2, kind: input, shape index: {}]   ;;  %s2817_s3 = inlined_call_operand.vmem [shape: f32[8,128], index: 3, kind: input, shape index: {}]   ;;  %s2818_s4 = inlined_call_operand.vmem [shape: f32[2,8,128], index: 4, kind: output, shape index: {}]  }
   0x1   :  { %s2380_s17 = smov 0   ;;  %s2382_s18 = smov 0  }
   0x2   :  { %s2384_s19 = smov 0   ;;  %s2386_s20 = smov 0  }
   0x3   :  { %s2388_s21 = smov 0  }
   0x4 LB: > { %s23_s22 = sadd.s32 1, %s2336_s19  ;;  %s26_s23 = sadd.s32 1, %s2340_s20  ;;  %s2344_s21 = sphi %s2388_s21, %s14_s21   ;;  %s2340_s20 = sphi %s2386_s20, %s2824_s20   ;;  %s2336_s19 = sphi %s2384_s19, %s2823_s19   ;;  %s2332_s18 = sphi %s2382_s18, %s2822_s18   ;;  %s2328_s17 = sphi %s2380_s17, %s2821_s17   ;;  %s2324_s16 = sphi %s2378_s16, %s2820_s16   ;;  %s2320_s15 = sphi %s2376_s15, %s2819_s15  }
   0x5   : > { %p24_p0 = scmp.ge.s32.totalorder %s23_s22, 2  ;;  %p42_p1 = scmp.ne.s32.totalorder %s2324_s16, %s2320_s15 }
   0x6   : > { %p43_p2 = scmp.eq.s32.totalorder %s2344_s21, 0  ;;  %s35_s27 = sadd.s32 1, %s2324_s16 }
   0x7   : > { %s2826_s22 = smov (%p24_p0, %s23_s22), 0  ;;  %s2828_s23 = smov (!%p24_p0, %s26_s23), %s2340_s20 }
   0x8   : > { %p44_p3 = por %p43_p2, %p42_p1  ;;  %p28_p4 = scmp.ge.s32.totalorder %s2828_s23, 2 }
   0x9   : > { %s31_s24 = ssub.s32 %s2336_s19, %s2826_s22  ;;  %p1734_p6 = scmp.ge.s32.totalorder %s2344_s21, 4 }
   0xa   : > { %s2830_s23 = smov (%p28_p4, %s2828_s23), 0 }
   0xb   : > { %s30_s25 = ssub.s32 %s2340_s20, %s2830_s23  ;;  %166 = sbr.rel (%p1734_p6) target bundleno = 41 (0x29), region = 28 }
   0xc   : > { %s32_s26 = sor.u32 %s31_s24, %s30_s25 }
   0xd   : > { %p33_p5 = scmp.eq.s32.totalorder %s32_s26, 0 }
   0xf   : > { %s2427_s28 = scalar_select %p33_p5, %s2324_s16, %s35_s27  }
  0x12   : > { %169 = sbr.rel (!%p44_p3) target bundleno = 41 (0x29), region = 32  ;;  %s171_s29 = sand.u32 (%p44_p3), 1, %s2324_s16  }
  0x13   : > { %s1736_s30 = sshll.u32 (%p44_p3), %s2336_s19, 4  ;;  %s1735_s5 = sshll.u32 (%p44_p3), %s171_s29, 8 }
  0x14   : > { %s1737_s6 = sshll.u32 (%p44_p3), %s2340_s20, 7  ;;  %s2441_s12 = scalar_lea.vmem (%p44_p3), [#allocation3], %s1735_s5 }
  0x15   : > { %s176_s7 = sadd.s32 (%p44_p3), %s1737_s6, %s1736_s30 }
  0x16   : > { %s1738_s8 = sshll.u32 (%p44_p3), %s176_s7, 2 }
  0x17   : > { %s2436_s11 = scalar_lea.vmem (%p44_p3), %s2814_s0, %s1738_s8 }
  0x18   : > { %v194_v0 = vld [vmem:[%s2436_s11] sm:$0xff] (%p44_p3)   ;;  %v198_v1 = vld [vmem:[%s2436_s11 + $0x8] sm:$0xff] (%p44_p3)   ;;  %v202_v2 = vld [vmem:[%s2436_s11 + $0x10] sm:$0xff] (%p44_p3)  }
  0x19   : > { %195 = vst [vmem:[%s2441_s12] sm:$0xff] %v194_v0   ;;  %199 = vst [vmem:[%s2441_s12 + $0x8] sm:$0xff] %v198_v1   ;;  %v206_v3 = vld [vmem:[%s2436_s11 + $0x18] sm:$0xff]   ;;  %v210_v4 = vld [vmem:[%s2436_s11 + $0x20] sm:$0xff]  }
  0x1a   : > { %203 = vst [vmem:[%s2441_s12 + $0x10] sm:$0xff] %v202_v2   ;;  %v214_v5 = vld [vmem:[%s2436_s11 + $0x28] sm:$0xff]   ;;  %207 = vst [vmem:[%s2441_s12 + $0x18] sm:$0xff] %v206_v3   ;;  %v218_v6 = vld [vmem:[%s2436_s11 + $0x30] sm:$0xff]  }
  0x1b   : > { %211 = vst [vmem:[%s2441_s12 + $0x20] sm:$0xff] %v210_v4   ;;  %215 = vst [vmem:[%s2441_s12 + $0x28] sm:$0xff] %v214_v5   ;;  %v222_v7 = vld [vmem:[%s2436_s11 + $0x38] sm:$0xff]   ;;  %v226_v8 = vld [vmem:[%s2436_s11 + $0x80] sm:$0xff]  }
  0x1c   : > { %219 = vst [vmem:[%s2441_s12 + $0x30] sm:$0xff] %v218_v6   ;;  %223 = vst [vmem:[%s2441_s12 + $0x38] sm:$0xff] %v222_v7   ;;  %v230_v9 = vld [vmem:[%s2436_s11 + $0x88] sm:$0xff]   ;;  %v234_v10 = vld [vmem:[%s2436_s11 + $0x90] sm:$0xff]  }
  0x1d   : > { %227 = vst [vmem:[%s2441_s12 + $0x40] sm:$0xff] %v226_v8   ;;  %v238_v11 = vld [vmem:[%s2436_s11 + $0x98] sm:$0xff]   ;;  %231 = vst [vmem:[%s2441_s12 + $0x48] sm:$0xff] %v230_v9   ;;  %v242_v12 = vld [vmem:[%s2436_s11 + $0xa0] sm:$0xff]  }
  0x1e   : > { %235 = vst [vmem:[%s2441_s12 + $0x50] sm:$0xff] %v234_v10   ;;  %239 = vst [vmem:[%s2441_s12 + $0x58] sm:$0xff] %v238_v11   ;;  %v246_v13 = vld [vmem:[%s2436_s11 + $0xa8] sm:$0xff]   ;;  %v250_v14 = vld [vmem:[%s2436_s11 + $0xb0] sm:$0xff]  }
  0x1f   : > { %243 = vst [vmem:[%s2441_s12 + $0x60] sm:$0xff] %v242_v12   ;;  %247 = vst [vmem:[%s2441_s12 + $0x68] sm:$0xff] %v246_v13   ;;  %v254_v15 = vld [vmem:[%s2436_s11 + $0xb8] sm:$0xff]   ;;  %v258_v16 = vld [vmem:[%s2436_s11 + $0x100] sm:$0xff]  }
  0x20   : > { %251 = vst [vmem:[%s2441_s12 + $0x70] sm:$0xff] %v250_v14   ;;  %v262_v17 = vld [vmem:[%s2436_s11 + $0x108] sm:$0xff]   ;;  %255 = vst [vmem:[%s2441_s12 + $0x78] sm:$0xff] %v254_v15   ;;  %v266_v18 = vld [vmem:[%s2436_s11 + $0x110] sm:$0xff]  }
  0x21   : > { %259 = vst [vmem:[%s2441_s12 + $0x80] sm:$0xff] %v258_v16   ;;  %263 = vst [vmem:[%s2441_s12 + $0x88] sm:$0xff] %v262_v17   ;;  %v270_v19 = vld [vmem:[%s2436_s11 + $0x118] sm:$0xff]   ;;  %v274_v20 = vld [vmem:[%s2436_s11 + $0x120] sm:$0xff]  }
  0x22   : > { %267 = vst [vmem:[%s2441_s12 + $0x90] sm:$0xff] %v266_v18   ;;  %271 = vst [vmem:[%s2441_s12 + $0x98] sm:$0xff] %v270_v19   ;;  %v278_v21 = vld [vmem:[%s2436_s11 + $0x128] sm:$0xff]   ;;  %v282_v22 = vld [vmem:[%s2436_s11 + $0x130] sm:$0xff]  }
  0x23   : > { %275 = vst [vmem:[%s2441_s12 + $0xa0] sm:$0xff] %v274_v20   ;;  %v286_v23 = vld [vmem:[%s2436_s11 + $0x138] sm:$0xff]   ;;  %279 = vst [vmem:[%s2441_s12 + $0xa8] sm:$0xff] %v278_v21   ;;  %v290_v24 = vld [vmem:[%s2436_s11 + $0x180] sm:$0xff]  }
  0x24   : > { %283 = vst [vmem:[%s2441_s12 + $0xb0] sm:$0xff] %v282_v22   ;;  %287 = vst [vmem:[%s2441_s12 + $0xb8] sm:$0xff] %v286_v23   ;;  %v294_v25 = vld [vmem:[%s2436_s11 + $0x188] sm:$0xff]   ;;  %v298_v26 = vld [vmem:[%s2436_s11 + $0x190] sm:$0xff]  }
  0x25   : > { %291 = vst [vmem:[%s2441_s12 + $0xc0] sm:$0xff] %v290_v24   ;;  %295 = vst [vmem:[%s2441_s12 + $0xc8] sm:$0xff] %v294_v25   ;;  %v302_v27 = vld [vmem:[%s2436_s11 + $0x198] sm:$0xff]   ;;  %v306_v28 = vld [vmem:[%s2436_s11 + $0x1a0] sm:$0xff]  }
  0x26   : > { %299 = vst [vmem:[%s2441_s12 + $0xd0] sm:$0xff] %v298_v26   ;;  %v310_v29 = vld [vmem:[%s2436_s11 + $0x1a8] sm:$0xff]   ;;  %303 = vst [vmem:[%s2441_s12 + $0xd8] sm:$0xff] %v302_v27   ;;  %v314_v30 = vld [vmem:[%s2436_s11 + $0x1b0] sm:$0xff]  }
  0x27   : > { %307 = vst [vmem:[%s2441_s12 + $0xe0] sm:$0xff] %v306_v28   ;;  %311 = vst [vmem:[%s2441_s12 + $0xe8] sm:$0xff] %v310_v29   ;;  %v318_v31 = vld [vmem:[%s2436_s11 + $0x1b8] sm:$0xff]  }
  0x28   : > { %315 = vst [vmem:[%s2441_s12 + $0xf0] sm:$0xff] %v314_v30   ;;  %319 = vst [vmem:[%s2441_s12 + $0xf8] sm:$0xff] %v318_v31  }
  0x29 PF: > { %p1739_p7 = scmp.ge.s32.totalorder %s2344_s21, 1  ;;  %p471_p8 = scmp.lt.s32.totalorder %s2344_s21, 5 }
  0x2b   : > { %p472_p9 = pnand %p1739_p7, %p471_p8 }
  0x2c   : > { %s478_s13 = sand.u32 (!%p472_p9), 1, %s2320_s15   ;;  %p503_p10 = scmp.lt.s32.totalorder (!%p472_p9), %s2332_s18, 1 }
  0x2d   : > { %475 = sbr.rel (%p472_p9) target bundleno = 1129 (0x469), region = 73  ;;  %s1740_s14 = sshll.u32 (!%p472_p9), %s478_s13, 8 }
  0x2e   : > { %s2514_s29 = scalar_lea.vmem (!%p472_p9), [#allocation3], %s1740_s14  ;;  %p1742_p11 = scmp.ne.s32.totalorder (!%p472_p9), %s2328_s17, 0 }
  0x34   : > { %s2832_s18 = smov (!%p503_p10, %s2332_s18), 1  ;;  %511 = sbr.rel (%p1742_p11) target bundleno = 59 (0x3b), region = 81 }
  0x35   : > { %s1741_s24 = sshll.u32 %s2832_s18, 3  ;;  %v2346_v32 = vmov (!%p1742_p11), 0.0  }
  0x36   : > { %s2512_s27 = scalar_lea.vmem %s2818_s4, %s1741_s24  ;;  %512 = vst [vmem:[#allocation2] sm:$0xff] (!%p1742_p11), %v2346_v32 }
  0x3b PF: > { %v2251_v33 = vld [vmem:[%s2815_s1] sm:$0xff]   ;;  %vm854_vm0 = vcmask 1041408   ;;  %v2252_v34 = vld [vmem:[%s2815_s1 + $0x8] sm:$0xff]   ;;  %vm855_vm1 = vcmask 1042432   ;;  %v2347_v36 = vmov 65535   ;;  %vm757_vm2 = vcmask 302080  }
  0x3c   : > { %1937 = vmatprep.subr.bf16.mxu0 %v2251_v33  ;;  %2184 = vmatprep.subr.bf16.mxu1 %v2251_v33  ;;  %v2253_v35 = vld [vmem:[%s2815_s1 + $0x10] ss:$0 sps:$4 sm:$0x77]   ;;  %v856_v37 = vsel %vm854_vm0, 4294967295, %v2347_v36  ;;  %v2254_v38 = vld [vmem:[%s2514_s29] sm:$0xff]   ;;  %v2258_v44 = vld [vmem:[%s2514_s29 + $0x10] sm:$0xff]  }
  0x3d   : > { %1938 = vmatpush3.bf16.msra.mxu0 %v2251_v33  ;;  %2187 = vmatpush3.bf16.msra.mxu1 %v2251_v33  ;;  %v857_v39 = vsel %vm855_vm1, %v856_v37, 0  ;;  %v2255_v41 = vld [vmem:[%s2514_s29 + $0x80] sm:$0xff]   ;;  %v2256_v42 = vld [vmem:[%s2514_s29 + $0x8] sm:$0xff]   ;;  %v2259_v45 = vld [vmem:[%s2514_s29 + $0x90] sm:$0xff]   ;;  %vm1303_vm3 = vcmask 1041409   ;;  %vm1305_vm4 = vcmask 1042434  }
  0x3e   : > { %1939 = vmatprep.subr.bf16.mxu0 %v2252_v34  ;;  %2185 = vmatprep.subr.bf16.mxu1 %v2252_v34  ;;  %v859_v40 = vand.u32 %v2253_v35, %v857_v39  ;;  %v2257_v43 = vld [vmem:[%s2514_s29 + $0x88] sm:$0xff]   ;;  %v2260_v46 = vld [vmem:[%s2514_s29 + $0x18] sm:$0xff]   ;;  %v2262_v48 = vld [vmem:[%s2514_s29 + $0x20] sm:$0xff]   ;;  %vm1307_vm5 = vcmask 1043459   ;;  %p1810_p12 = scmp.ne.s32.totalorder %s2328_s17, 1 }
  0x3f   : > { %1943 = vmatprep.mubr.msk.bf16.mxu0 %vm757_vm2, %v2254_v38  ;;  %1975 = vmatprep.mubr.msk.bf16.mxu1 %vm757_vm2, %v2255_v41  ;;  %v2261_v47 = vld [vmem:[%s2514_s29 + $0x98] sm:$0xff]   ;;  %v2263_v49 = vld [vmem:[%s2514_s29 + $0xa0] sm:$0xff]   ;;  %v2264_v50 = vld [vmem:[%s2514_s29 + $0x28] sm:$0xff]   ;;  %vm2349_vm6 = vmmov (!%p1810_p12), 0   ;;  %vm1411_vm7 = vcmask (!%p1810_p12), 1043456  }
  0x40   : > { %v2265_v51 = vld [vmem:[%s2514_s29 + $0xa8] sm:$0xff]   ;;  %v2266_v52 = vld [vmem:[%s2514_s29 + $0x30] sm:$0xff]   ;;  %v2268_v54 = vld [vmem:[%s2514_s29 + $0x38] sm:$0xff]  }
  0x41   : > { %1940 = vmatpush3.bf16.msra.mxu0 %v2252_v34  ;;  %2188 = vmatpush3.bf16.msra.mxu1 %v2252_v34  ;;  %v2267_v53 = vld [vmem:[%s2514_s29 + $0xb0] sm:$0xff]   ;;  %v2269_v55 = vld [vmem:[%s2514_s29 + $0xb8] sm:$0xff]   ;;  %v2270_v56 = vld [vmem:[%s2514_s29 + $0x40] sm:$0xff]  }
  0x42   : > { %1941 = vmatprep.subr.bf16.mxu0 %v859_v40  ;;  %2186 = vmatprep.subr.bf16.mxu1 %v859_v40  ;;  %v2271_v57 = vld [vmem:[%s2514_s29 + $0xc0] sm:$0xff]   ;;  %v2272_v58 = vld [vmem:[%s2514_s29 + $0x48] sm:$0xff]   ;;  %v2274_v60 = vld [vmem:[%s2514_s29 + $0x50] sm:$0xff]  }
  0x43   : > { %v2273_v59 = vld [vmem:[%s2514_s29 + $0xc8] sm:$0xff]   ;;  %v2275_v61 = vld [vmem:[%s2514_s29 + $0xd0] sm:$0xff]   ;;  %v2276_v62 = vld [vmem:[%s2514_s29 + $0x58] sm:$0xff]  }
  0x44   : > { %v2277_v63 = vld [vmem:[%s2514_s29 + $0xd8] sm:$0xff]   ;;  %v2278_v0 = vld [vmem:[%s2514_s29 + $0x60] sm:$0xff]   ;;  %v2280_v2 = vld [vmem:[%s2514_s29 + $0x68] sm:$0xff]  }
  0x45   : > { %1942 = vmatpush3.bf16.msra.mxu0 %v859_v40  ;;  %2189 = vmatpush3.bf16.msra.mxu1 %v859_v40  ;;  %v2279_v1 = vld [vmem:[%s2514_s29 + $0xe0] sm:$0xff]   ;;  %v2281_v3 = vld [vmem:[%s2514_s29 + $0xe8] sm:$0xff]   ;;  %v2282_v4 = vld [vmem:[%s2514_s29 + $0x70] sm:$0xff]  }
  0x46   : > { %v2283_v5 = vld [vmem:[%s2514_s29 + $0xf0] sm:$0xff]   ;;  %v2284_v6 = vld [vmem:[%s2514_s29 + $0x78] sm:$0xff]  }
  0x47   : > { %v2285_v7 = vld [vmem:[%s2514_s29 + $0xf8] sm:$0xff]  }
  0x48   : > { %1944 = vmatmul.mubr.msk.bf16.vlgmr.msra.gmra.mrb[0].mxu0 %vm757_vm2, %v2256_v42  ;;  %1976 = vmatmul.mubr.msk.bf16.vlgmr.msra.gmra.mrb[0].mxu1 %vm757_vm2, %v2257_v43 }
  0x49   : > { %1947 = vmatprep.mubr.msk.bf16.mxu0 %vm757_vm2, %v2258_v44  ;;  %1979 = vmatprep.mubr.msk.bf16.mxu1 %vm757_vm2, %v2259_v45 }
  0x50   : > { %1948 = vmatmul.mubr.msk.bf16.gmra.mrb[4].mxu0 %vm757_vm2, %v2260_v46  ;;  %1980 = vmatmul.mubr.msk.bf16.gmra.mrb[4].mxu1 %vm757_vm2, %v2261_v47 }
  0x51   : > { %1951 = vmatprep.mubr.msk.bf16.mxu0 %vm757_vm2, %v2262_v48  ;;  %1983 = vmatprep.mubr.msk.bf16.mxu1 %vm757_vm2, %v2263_v49 }
  0x58   : > { %1952 = vmatmul.mubr.msk.bf16.gmra.mrb[8].mxu0 %vm757_vm2, %v2264_v50  ;;  %1984 = vmatmul.mubr.msk.bf16.gmra.mrb[8].mxu1 %vm757_vm2, %v2265_v51 }
  0x59   : > { %1955 = vmatprep.mubr.msk.bf16.mxu0 %vm757_vm2, %v2266_v52  ;;  %1987 = vmatprep.mubr.msk.bf16.mxu1 %vm757_vm2, %v2267_v53 }
  0x60   : > { %1956 = vmatmul.mubr.msk.bf16.gmra.mrb[12].mxu0 %vm757_vm2, %v2268_v54  ;;  %1988 = vmatmul.mubr.msk.bf16.gmra.mrb[12].mxu1 %vm757_vm2, %v2269_v55 }
  0x61   : > { %1959 = vmatprep.mubr.msk.bf16.mxu0 %vm757_vm2, %v2270_v56  ;;  %1991 = vmatprep.mubr.msk.bf16.mxu1 %vm757_vm2, %v2271_v57 }
  0x68   : > { %1960 = vmatmul.mubr.msk.bf16.gmra.mrb[16].mxu0 %vm757_vm2, %v2272_v58  ;;  %1992 = vmatmul.mubr.msk.bf16.gmra.mrb[16].mxu1 %vm757_vm2, %v2273_v59 }
  0x69   : > { %1963 = vmatprep.mubr.msk.bf16.mxu0 %vm757_vm2, %v2274_v60  ;;  %1995 = vmatprep.mubr.msk.bf16.mxu1 %vm757_vm2, %v2275_v61 }
  0x70   : > { %1964 = vmatmul.mubr.msk.bf16.gmra.mrb[20].mxu0 %vm757_vm2, %v2276_v62  ;;  %1996 = vmatmul.mubr.msk.bf16.gmra.mrb[20].mxu1 %vm757_vm2, %v2277_v63 }
  0x71   : > { %1967 = vmatprep.mubr.msk.bf16.mxu0 %vm757_vm2, %v2278_v0  ;;  %1999 = vmatprep.mubr.msk.bf16.mxu1 %vm757_vm2, %v2279_v1 }
  0x78   : > { %1968 = vmatmul.mubr.msk.bf16.gmra.mrb[24].mxu0 %vm757_vm2, %v2280_v2  ;;  %2000 = vmatmul.mubr.msk.bf16.gmra.mrb[24].mxu1 %vm757_vm2, %v2281_v3 }
  0x79   : > { %1971 = vmatprep.mubr.msk.bf16.mxu0 %vm757_vm2, %v2282_v4  ;;  %2003 = vmatprep.mubr.msk.bf16.mxu1 %vm757_vm2, %v2283_v5 }
  0x80   : > { %1972 = vmatmul.mubr.msk.bf16.gmra.mrb[28].mxu0 %vm757_vm2, %v2284_v6  ;;  %2004 = vmatmul.mubr.msk.bf16.gmra.mrb[28].mxu1 %vm757_vm2, %v2285_v7 }
 0x11b   : > { %v1945_v8 = vpop.f32.mrb[0].mxu0  ;;  %v1977_v9 = vpop.f32.mrb[0].mxu1 }
 0x11c   : > { %v895_v10 = vpop.f32.mrb[1].mxu0  ;;  %v1023_v11 = vpop.f32.mrb[1].mxu1  ;;  %v1152_v20 = vmax.f32 %v1945_v8, 0.0  ;;  %v1184_v21 = vmax.f32 %v1977_v9, 0.0 }
 0x11d   : > { %v1182_v12 = vmax.f32 %v1023_v11, 0.0  ;;  %v1946_v13 = vpop.f32.mrb[2].mxu0  ;;  %v1978_v14 = vpop.f32.mrb[2].mxu1  ;;  %v1150_v17 = vmax.f32 %v895_v10, 0.0 }
 0x11e   : > { %v898_v15 = vpop.f32.mrb[3].mxu0  ;;  %v1026_v16 = vpop.f32.mrb[3].mxu1  ;;  %v1153_v24 = vmax.f32 %v1946_v13, 0.0  ;;  %v1185_v25 = vmax.f32 %v1978_v14, 0.0 }
 0x11f   : > { %v1151_v18 = vmax.f32 %v898_v15, 0.0  ;;  %v1183_v19 = vmax.f32 %v1026_v16, 0.0 }
 0x121   : > { %v1214_v22 = vadd.f32 %v1151_v18, %v1150_v17  ;;  %v1256_v23 = vadd.f32 %v1183_v19, %v1182_v12 }
 0x123   : > { %v1215_v26 = vadd.f32 %v1214_v22, %v1152_v20  ;;  %v1257_v27 = vadd.f32 %v1256_v23, %v1184_v21  ;;  %v1949_v28 = vpop.f32.mrb[4].mxu0  ;;  %v1981_v29 = vpop.f32.mrb[4].mxu1 }
 0x124   : > { %v911_v30 = vpop.f32.mrb[5].mxu0  ;;  %v1039_v31 = vpop.f32.mrb[5].mxu1  ;;  %v1156_v44 = vmax.f32 %v1949_v28, 0.0  ;;  %v1188_v45 = vmax.f32 %v1981_v29, 0.0 }
 0x125   : > { %v1154_v32 = vmax.f32 %v911_v30, 0.0  ;;  %v1216_v33 = vadd.f32 %v1215_v26, %v1153_v24  ;;  %v1186_v34 = vmax.f32 %v1039_v31, 0.0  ;;  %v1258_v35 = vadd.f32 %v1257_v27, %v1185_v25  ;;  %v1950_v36 = vpop.f32.mrb[6].mxu0  ;;  %v1982_v37 = vpop.f32.mrb[6].mxu1 }
 0x126   : > { %v914_v38 = vpop.f32.mrb[7].mxu0  ;;  %v1042_v39 = vpop.f32.mrb[7].mxu1  ;;  %v1157_v48 = vmax.f32 %v1950_v36, 0.0  ;;  %v1189_v49 = vmax.f32 %v1982_v37, 0.0 }
 0x127   : > { %v1217_v40 = vadd.f32 %v1216_v33, %v1154_v32  ;;  %v1259_v41 = vadd.f32 %v1258_v35, %v1186_v34  ;;  %v1155_v42 = vmax.f32 %v914_v38, 0.0  ;;  %v1187_v43 = vmax.f32 %v1042_v39, 0.0 }
 0x129   : > { %v1218_v46 = vadd.f32 %v1217_v40, %v1155_v42  ;;  %v1260_v47 = vadd.f32 %v1259_v41, %v1187_v43 }
 0x12b   : > { %v1219_v50 = vadd.f32 %v1218_v46, %v1156_v44  ;;  %v1261_v51 = vadd.f32 %v1260_v47, %v1188_v45  ;;  %v1953_v52 = vpop.f32.mrb[8].mxu0  ;;  %v1985_v53 = vpop.f32.mrb[8].mxu1 }
 0x12c   : > { %v927_v54 = vpop.f32.mrb[9].mxu0  ;;  %v1055_v55 = vpop.f32.mrb[9].mxu1  ;;  %v1160_v4 = vmax.f32 %v1953_v52, 0.0  ;;  %v1192_v5 = vmax.f32 %v1985_v53, 0.0 }
 0x12d   : > { %v1158_v56 = vmax.f32 %v927_v54, 0.0  ;;  %v1220_v57 = vadd.f32 %v1219_v50, %v1157_v48  ;;  %v1190_v58 = vmax.f32 %v1055_v55, 0.0  ;;  %v1262_v59 = vadd.f32 %v1261_v51, %v1189_v49  ;;  %v1954_v60 = vpop.f32.mrb[10].mxu0  ;;  %v1986_v61 = vpop.f32.mrb[10].mxu1 }
 0x12e   : > { %v930_v62 = vpop.f32.mrb[11].mxu0  ;;  %v1058_v63 = vpop.f32.mrb[11].mxu1  ;;  %v1161_v8 = vmax.f32 %v1954_v60, 0.0  ;;  %v1193_v9 = vmax.f32 %v1986_v61, 0.0 }
 0x12f   : > { %v1221_v0 = vadd.f32 %v1220_v57, %v1158_v56  ;;  %v1263_v1 = vadd.f32 %v1262_v59, %v1190_v58  ;;  %v1159_v2 = vmax.f32 %v930_v62, 0.0  ;;  %v1191_v3 = vmax.f32 %v1058_v63, 0.0 }
 0x131   : > { %v1222_v6 = vadd.f32 %v1221_v0, %v1159_v2  ;;  %v1264_v7 = vadd.f32 %v1263_v1, %v1191_v3 }
 0x133   : > { %v1223_v10 = vadd.f32 %v1222_v6, %v1160_v4  ;;  %v1265_v11 = vadd.f32 %v1264_v7, %v1192_v5  ;;  %v1957_v12 = vpop.f32.mrb[12].mxu0  ;;  %v1989_v13 = vpop.f32.mrb[12].mxu1 }
 0x134   : > { %v943_v14 = vpop.f32.mrb[13].mxu0  ;;  %v1071_v15 = vpop.f32.mrb[13].mxu1  ;;  %v1164_v28 = vmax.f32 %v1957_v12, 0.0  ;;  %v1196_v29 = vmax.f32 %v1989_v13, 0.0 }
 0x135   : > { %v1162_v16 = vmax.f32 %v943_v14, 0.0  ;;  %v1224_v17 = vadd.f32 %v1223_v10, %v1161_v8  ;;  %v1194_v18 = vmax.f32 %v1071_v15, 0.0  ;;  %v1266_v19 = vadd.f32 %v1265_v11, %v1193_v9  ;;  %v1958_v20 = vpop.f32.mrb[14].mxu0  ;;  %v1990_v21 = vpop.f32.mrb[14].mxu1 }
 0x136   : > { %v946_v22 = vpop.f32.mrb[15].mxu0  ;;  %v1074_v23 = vpop.f32.mrb[15].mxu1  ;;  %v1165_v32 = vmax.f32 %v1958_v20, 0.0  ;;  %v1197_v33 = vmax.f32 %v1990_v21, 0.0 }
 0x137   : > { %v1225_v24 = vadd.f32 %v1224_v17, %v1162_v16  ;;  %v1267_v25 = vadd.f32 %v1266_v19, %v1194_v18  ;;  %v1163_v26 = vmax.f32 %v946_v22, 0.0  ;;  %v1195_v27 = vmax.f32 %v1074_v23, 0.0 }
 0x139   : > { %v1226_v30 = vadd.f32 %v1225_v24, %v1163_v26  ;;  %v1268_v31 = vadd.f32 %v1267_v25, %v1195_v27 }
 0x13b   : > { %v1227_v34 = vadd.f32 %v1226_v30, %v1164_v28  ;;  %v1269_v35 = vadd.f32 %v1268_v31, %v1196_v29  ;;  %v1961_v36 = vpop.f32.mrb[16].mxu0  ;;  %v1993_v37 = vpop.f32.mrb[16].mxu1 }
 0x13c   : > { %v959_v38 = vpop.f32.mrb[17].mxu0  ;;  %v1087_v39 = vpop.f32.mrb[17].mxu1  ;;  %v1168_v50 = vmax.f32 %v1961_v36, 0.0  ;;  %v1200_v51 = vmax.f32 %v1993_v37, 0.0 }
 0x13d   : > { %v2590_v40 = vadd.f32 %v1227_v34, %v1165_v32  ;;  %v2592_v41 = vadd.f32 %v1269_v35, %v1197_v33  ;;  %v1198_v42 = vmax.f32 %v1087_v39, 0.0  ;;  %v1962_v43 = vpop.f32.mrb[18].mxu0  ;;  %v1994_v44 = vpop.f32.mrb[18].mxu1  ;;  %v1166_v47 = vmax.f32 %v959_v38, 0.0 }
 0x13e   : > { %v962_v45 = vpop.f32.mrb[19].mxu0  ;;  %v1090_v46 = vpop.f32.mrb[19].mxu1  ;;  %v1169_v54 = vmax.f32 %v1962_v43, 0.0  ;;  %v1201_v59 = vmax.f32 %v1994_v44, 0.0 }
 0x13f   : > { %v1167_v48 = vmax.f32 %v962_v45, 0.0  ;;  %v1199_v49 = vmax.f32 %v1090_v46, 0.0 }
 0x141   : > { %v1235_v52 = vadd.f32 %v1167_v48, %v1166_v47  ;;  %v1277_v53 = vadd.f32 %v1199_v49, %v1198_v42  ;;  %v1229_v48 = vrot.slane %v2590_v40, 4 }
 0x143   : > { %v1236_v55 = vadd.f32 %v1235_v52, %v1168_v50  ;;  %v1278_v56 = vadd.f32 %v1277_v53, %v1200_v51  ;;  %v1965_v57 = vpop.f32.mrb[20].mxu0  ;;  %v1997_v58 = vpop.f32.mrb[20].mxu1 }
 0x144   : > { %v975_v60 = vpop.f32.mrb[21].mxu0  ;;  %v1103_v61 = vpop.f32.mrb[21].mxu1  ;;  %v1172_v10 = vmax.f32 %v1965_v57, 0.0  ;;  %v1204_v12 = vmax.f32 %v1997_v58, 0.0 }
 0x145   : > { %v1170_v62 = vmax.f32 %v975_v60, 0.0  ;;  %v1237_v63 = vadd.f32 %v1236_v55, %v1169_v54  ;;  %v1966_v0 = vpop.f32.mrb[22].mxu0  ;;  %v1998_v1 = vpop.f32.mrb[22].mxu1  ;;  %v1202_v2 = vmax.f32 %v1103_v61, 0.0  ;;  %v1279_v3 = vadd.f32 %v1278_v56, %v1201_v59 }
 0x146   : > { %v978_v4 = vpop.f32.mrb[23].mxu0  ;;  %v1106_v5 = vpop.f32.mrb[23].mxu1  ;;  %v1173_v14 = vmax.f32 %v1966_v0, 0.0  ;;  %v1205_v18 = vmax.f32 %v1998_v1, 0.0  ;;  %v1271_v54 = vrot.slane %v2592_v41, 4 }
 0x147   : > { %v1238_v6 = vadd.f32 %v1237_v63, %v1170_v62  ;;  %v1171_v7 = vmax.f32 %v978_v4, 0.0  ;;  %v1280_v8 = vadd.f32 %v1279_v3, %v1202_v2  ;;  %v1203_v9 = vmax.f32 %v1106_v5, 0.0 }
 0x148   : > { %v1230_v62 = vadd.f32 %v1229_v48, %v2590_v40  ;;  %v1272_v1 = vadd.f32 %v1271_v54, %v2592_v41 }
 0x149   : > { %v1239_v11 = vadd.f32 %v1238_v6, %v1171_v7  ;;  %v1281_v13 = vadd.f32 %v1280_v8, %v1203_v9 }
 0x14a   : > { %v1231_v8 = vrot.slane %v1230_v62, 2 }
 0x14b   : > { %v1240_v15 = vadd.f32 %v1239_v11, %v1172_v10  ;;  %v1969_v16 = vpop.f32.mrb[24].mxu0  ;;  %v2001_v17 = vpop.f32.mrb[24].mxu1  ;;  %v1282_v19 = vadd.f32 %v1281_v13, %v1204_v12  ;;  %v1273_v10 = vrot.slane %v1272_v1, 2 }
 0x14c   : > { %v991_v20 = vpop.f32.mrb[25].mxu0  ;;  %v1119_v21 = vpop.f32.mrb[25].mxu1  ;;  %v1176_v34 = vmax.f32 %v1969_v16, 0.0  ;;  %v1208_v36 = vmax.f32 %v2001_v17, 0.0 }
 0x14d   : > { %v1174_v22 = vmax.f32 %v991_v20, 0.0  ;;  %v1241_v23 = vadd.f32 %v1240_v15, %v1173_v14  ;;  %v1206_v24 = vmax.f32 %v1119_v21, 0.0  ;;  %v1970_v25 = vpop.f32.mrb[26].mxu0  ;;  %v2002_v26 = vpop.f32.mrb[26].mxu1  ;;  %v1283_v27 = vadd.f32 %v1282_v19, %v1205_v18 }
 0x14e   : > { %v994_v28 = vpop.f32.mrb[27].mxu0  ;;  %v1122_v29 = vpop.f32.mrb[27].mxu1  ;;  %v1177_v38 = vmax.f32 %v1970_v25, 0.0  ;;  %v1209_v44 = vmax.f32 %v2002_v26, 0.0  ;;  %v1232_v14 = vadd.f32 %v1231_v8, %v1230_v62  ;;  %v1274_v16 = vadd.f32 %v1273_v10, %v1272_v1  ;;  %v1820_v8 = vld [vmem:[%s2816_s2 + $0xb0] sm:$0xff] (!%p1810_p12) }
 0x14f   : > { %v1242_v30 = vadd.f32 %v1241_v23, %v1174_v22  ;;  %v1175_v31 = vmax.f32 %v994_v28, 0.0  ;;  %v1207_v32 = vmax.f32 %v1122_v29, 0.0  ;;  %v1284_v33 = vadd.f32 %v1283_v27, %v1206_v24  ;;  %v1298_v29 = vld [vmem:[#allocation2] sm:$0xf] }
 0x150   : > { %v1233_v19 = vrot.slane %v1232_v14, 1  ;;  %v1275_v20 = vrot.slane %v1274_v16, 1 }
 0x151   : > { %v1243_v35 = vadd.f32 %v1242_v30, %v1175_v31  ;;  %v1285_v37 = vadd.f32 %v1284_v33, %v1207_v32  ;;  %v1318_v33 = vld [vmem:[%s2816_s2] sm:$0xff] (!%p1810_p12) }
 0x152   : > { %v1234_v24 = vadd.f32 %v1233_v19, %v1232_v14  ;;  %v1276_v26 = vadd.f32 %v1275_v20, %v1274_v16  ;;  %v1824_v14 = vld [vmem:[%s2816_s2 + $0xd0] sm:$0xff] (!%p1810_p12) }
 0x153   : > { %v1244_v39 = vadd.f32 %v1243_v35, %v1176_v34  ;;  %v1973_v42 = vpop.f32.mrb[28].mxu0  ;;  %v2005_v43 = vpop.f32.mrb[28].mxu1  ;;  %v1286_v45 = vadd.f32 %v1285_v37, %v1208_v36  ;;  %v1319_v34 = vld [vmem:[%s2816_s2 + $0x8] sm:$0xff] (!%p1810_p12)  ;;  %v1320_v35 = vld [vmem:[%s2816_s2 + $0x10] sm:$0xff] (!%p1810_p12)  ;;  %v2348_v36 = vmov (!%p1810_p12), 0.0|0.0  }
 0x154   : > { %v1007_v46 = vpop.f32.mrb[29].mxu0  ;;  %v1135_v47 = vpop.f32.mrb[29].mxu1  ;;  %v1180_v63 = vmax.f32 %v1973_v42, 0.0  ;;  %v1212_v2 = vmax.f32 %v2005_v43, 0.0  ;;  %2112 = vmatprep.subr.bf16.mxu0 (!%p1810_p12), %v2348_v36  ;;  %v2113_v37 = vpack.c.bf16 (!%p1810_p12), %v1319_v34, %v1318_v33  ;;  %2136 = vmatprep.subr.bf16.mxu1 (!%p1810_p12), %v2348_v36  ;;  %v1322_v43 = vld [vmem:[%s2816_s2 + $0x20] sm:$0xff] (!%p1810_p12)  ;;  %v1828_v19 = vld [vmem:[%s2816_s2 + $0xf0] sm:$0xff] (!%p1810_p12) }
 0x155   : > { %v1178_v49 = vmax.f32 %v1007_v46, 0.0  ;;  %v1245_v50 = vadd.f32 %v1244_v39, %v1177_v38  ;;  %v1210_v51 = vmax.f32 %v1135_v47, 0.0  ;;  %v1974_v52 = vpop.f32.mrb[30].mxu0  ;;  %v2006_v53 = vpop.f32.mrb[30].mxu1  ;;  %v1287_v55 = vadd.f32 %v1286_v45, %v1209_v44  ;;  %v1321_v38 = vld [vmem:[%s2816_s2 + $0x18] sm:$0xff] (!%p1810_p12)  ;;  %v1323_v44 = vld [vmem:[%s2816_s2 + $0x28] sm:$0xff] (!%p1810_p12) }
 0x156   : > { %v1010_v56 = vpop.f32.mrb[31].mxu0  ;;  %v1138_v57 = vpop.f32.mrb[31].mxu1  ;;  %v1181_v4 = vmax.f32 %v1974_v52, 0.0  ;;  %v1213_v6 = vmax.f32 %v2006_v53, 0.0  ;;  %v2350_v39 = vmov (!%p1810_p12), 0.0   ;;  %2114 = vmatpush3.bf16.msra.mxu0 (!%p1810_p12), %v2113_v37  ;;  %v2116_v42 = vpack.c.bf16 (!%p1810_p12), %v1321_v38, %v1320_v35  ;;  %v1324_v46 = vld [vmem:[%s2816_s2 + $0x30] sm:$0xff] (!%p1810_p12) }
 0x157   : > { %v1246_v58 = vadd.f32 %v1245_v50, %v1178_v49  ;;  %v1179_v59 = vmax.f32 %v1010_v56, 0.0  ;;  %v1211_v60 = vmax.f32 %v1138_v57, 0.0  ;;  %v1288_v61 = vadd.f32 %v1287_v55, %v1210_v51  ;;  %2039 = vmatprep.mubr.msk.f32.mxu0 (!%p1810_p12), %vm2349_vm6, %v2350_v39  ;;  %2074 = vmatprep.mubr.msk.f32.mxu1 (!%p1810_p12), %vm2349_vm6, %v2350_v39  ;;  %v1325_v47 = vld [vmem:[%s2816_s2 + $0x38] sm:$0xff] (!%p1810_p12)  ;;  %v1326_v49 = vld [vmem:[%s2816_s2 + $0x40] sm:$0xff] (!%p1810_p12)  ;;  %v1327_v50 = vld [vmem:[%s2816_s2 + $0x48] sm:$0xff] (!%p1810_p12) }
 0x158   : > { %2115 = vmatprep.subr.bf16.mxu0 (!%p1810_p12), %v2348_v36  ;;  %v2119_v45 = vpack.c.bf16 (!%p1810_p12), %v1323_v44, %v1322_v43  ;;  %v2122_v48 = vpack.c.bf16 (!%p1810_p12), %v1325_v47, %v1324_v46  ;;  %v2125_v51 = vpack.c.bf16 (!%p1810_p12), %v1327_v50, %v1326_v49  ;;  %v1328_v52 = vld [vmem:[%s2816_s2 + $0x50] sm:$0xff] (!%p1810_p12)  ;;  %v1329_v53 = vld [vmem:[%s2816_s2 + $0x58] sm:$0xff] (!%p1810_p12)  ;;  %v1330_v55 = vld [vmem:[%s2816_s2 + $0x60] sm:$0xff] (!%p1810_p12) }
 0x159   : > { %v1247_v0 = vadd.f32 %v1246_v58, %v1179_v59  ;;  %v1289_v3 = vadd.f32 %v1288_v61, %v1211_v60  ;;  %v2128_v54 = vpack.c.bf16 (!%p1810_p12), %v1329_v53, %v1328_v52  ;;  %v1331_v56 = vld [vmem:[%s2816_s2 + $0x68] sm:$0xff] (!%p1810_p12)  ;;  %v1332_v58 = vld [vmem:[%s2816_s2 + $0x70] sm:$0xff] (!%p1810_p12)  ;;  %v1333_v59 = vld [vmem:[%s2816_s2 + $0x78] sm:$0xff] (!%p1810_p12) }
 0x15a   : > { %2117 = vmatpush3.bf16.msra.mxu0 (!%p1810_p12), %v2116_v42  ;;  %v2131_v57 = vpack.c.bf16 (!%p1810_p12), %v1331_v56, %v1330_v55  ;;  %v2134_v60 = vpack.c.bf16 (!%p1810_p12), %v1333_v59, %v1332_v58  ;;  %v1813_v50 = vld [vmem:[%s2817_s3 + $0x2] ss:$0 sm:$0xff] (!%p1810_p12)  ;;  %v1834_v55 = vld [vmem:[%s2816_s2 + $0x108] sm:$0xff] (!%p1810_p12)  ;;  %v1836_v58 = vld [vmem:[%s2816_s2 + $0x118] sm:$0xff] (!%p1810_p12) }
 0x15b   : > { %v1248_v5 = vadd.f32 %v1247_v0, %v1180_v63  ;;  %v1290_v7 = vadd.f32 %v1289_v3, %v1212_v2  ;;  %2118 = vmatprep.subr.bf16.mxu0 (!%p1810_p12), %v2348_v36  ;;  %v1814_v63 = vld [vmem:[%s2816_s2 + $0x80] sm:$0xff] (!%p1810_p12)  ;;  %v1815_v0 = vld [vmem:[%s2816_s2 + $0x88] sm:$0xff] (!%p1810_p12)  ;;  %v1816_v2 = vld [vmem:[%s2816_s2 + $0x90] sm:$0xff] (!%p1810_p12) }
 0x15c   : > { %v2137_v1 = vpack.c.bf16 (!%p1810_p12), %v1815_v0, %v1814_v63  ;;  %v1817_v3 = vld [vmem:[%s2816_s2 + $0x98] sm:$0xff] (!%p1810_p12)  ;;  %v1839_v63 = vld [vmem:[%s2816_s2 + $0x130] sm:$0xff] (!%p1810_p12) }
 0x15d   : > { %v1249_v9 = vadd.f32 %v1248_v5, %v1181_v4  ;;  %v1291_v11 = vadd.f32 %v1290_v7, %v1213_v6  ;;  %v2140_v4 = vpack.c.bf16 (!%p1810_p12), %v1817_v3, %v1816_v2  ;;  %v1818_v5 = vld [vmem:[%s2816_s2 + $0xa0] sm:$0xff] (!%p1810_p12)  ;;  %v1819_v6 = vld [vmem:[%s2816_s2 + $0xa8] sm:$0xff] (!%p1810_p12)  ;;  %v1840_v0 = vld [vmem:[%s2816_s2 + $0x138] sm:$0xff] (!%p1810_p12) }
 0x15e   : > { %2120 = vmatpush3.bf16.msra.mxu0 (!%p1810_p12), %v2119_v45  ;;  %2138 = vmatpush3.bf16.msra.mxu1 (!%p1810_p12), %v2137_v1  ;;  %v2143_v7 = vpack.c.bf16 (!%p1810_p12), %v1819_v6, %v1818_v5  ;;  %v2170_v1 = vpack.c.bf16 (!%p1810_p12), %v1840_v0, %v1839_v63  ;;  %v1841_v2 = vld [vmem:[%s2816_s2 + $0x140] sm:$0xff] (!%p1810_p12)  ;;  %v1842_v3 = vld [vmem:[%s2816_s2 + $0x148] sm:$0xff] (!%p1810_p12)  ;;  %v1843_v5 = vld [vmem:[%s2816_s2 + $0x150] sm:$0xff] (!%p1810_p12) }
 0x15f   : > { %v1250_v12 = vrot.slane %v1249_v9, 4  ;;  %v1292_v13 = vrot.slane %v1291_v11, 4  ;;  %2121 = vmatprep.subr.bf16.mxu0 (!%p1810_p12), %v2348_v36  ;;  %2139 = vmatprep.subr.bf16.mxu1 (!%p1810_p12), %v2348_v36  ;;  %v1844_v6 = vld [vmem:[%s2816_s2 + $0x158] sm:$0xff] (!%p1810_p12) }
 0x161   : > { %v1251_v15 = vadd.f32 %v1250_v12, %v1249_v9  ;;  %v1293_v40 = vadd.f32 %v1292_v13, %v1291_v11  ;;  %v1821_v9 = vld [vmem:[%s2816_s2 + $0xb8] sm:$0xff] (!%p1810_p12)  ;;  %v1822_v11 = vld [vmem:[%s2816_s2 + $0xc0] sm:$0xff] (!%p1810_p12)  ;;  %v1823_v12 = vld [vmem:[%s2816_s2 + $0xc8] sm:$0xff] (!%p1810_p12) }
 0x162   : > { %2123 = vmatpush3.bf16.msra.mxu0 (!%p1810_p12), %v2122_v48  ;;  %2141 = vmatpush3.bf16.msra.mxu1 (!%p1810_p12), %v2140_v4  ;;  %v2146_v10 = vpack.c.bf16 (!%p1810_p12), %v1821_v9, %v1820_v8  ;;  %v2149_v13 = vpack.c.bf16 (!%p1810_p12), %v1823_v12, %v1822_v11  ;;  %v1812_v48 = vld [vmem:[%s2817_s3 + $0x1] ss:$0 sm:$0xff] (!%p1810_p12)  ;;  %v2173_v4 = vpack.c.bf16 (!%p1810_p12), %v1842_v3, %v1841_v2  ;;  %v1846_v9 = vld [vmem:[%s2816_s2 + $0x168] sm:$0xff] (!%p1810_p12)  ;;  %v1847_v11 = vld [vmem:[%s2816_s2 + $0x170] sm:$0xff] (!%p1810_p12) }
 0x163   : > { %v1252_v17 = vrot.slane %v1251_v15, 2  ;;  %v1294_v18 = vrot.slane %v1293_v40, 2  ;;  %2124 = vmatprep.subr.bf16.mxu0 (!%p1810_p12), %v2348_v36  ;;  %2142 = vmatprep.subr.bf16.mxu1 (!%p1810_p12), %v2348_v36  ;;  %v1845_v8 = vld [vmem:[%s2816_s2 + $0x160] sm:$0xff] (!%p1810_p12)  ;;  %v1848_v12 = vld [vmem:[%s2816_s2 + $0x178] sm:$0xff] (!%p1810_p12) }
 0x165   : > { %v1253_v41 = vadd.f32 %v1252_v17, %v1251_v15  ;;  %v1295_v21 = vadd.f32 %v1294_v18, %v1293_v40  ;;  %v1825_v15 = vld [vmem:[%s2816_s2 + $0xd8] sm:$0xff] (!%p1810_p12)  ;;  %v1826_v40 = vld [vmem:[%s2816_s2 + $0xe0] sm:$0xff] (!%p1810_p12)  ;;  %v1827_v17 = vld [vmem:[%s2816_s2 + $0xe8] sm:$0xff] (!%p1810_p12) }
 0x166   : > { %2126 = vmatpush3.bf16.msra.mxu0 (!%p1810_p12), %v2125_v51  ;;  %2144 = vmatpush3.bf16.msra.mxu1 (!%p1810_p12), %v2143_v7  ;;  %v2152_v16 = vpack.c.bf16 (!%p1810_p12), %v1825_v15, %v1824_v14  ;;  %v2155_v18 = vpack.c.bf16 (!%p1810_p12), %v1827_v17, %v1826_v40  ;;  %v2176_v7 = vpack.c.bf16 (!%p1810_p12), %v1844_v6, %v1843_v5  ;;  %v1830_v14 = vld [vmem:[%s2817_s3 + $0x3] ss:$0 sm:$0xff] (!%p1810_p12) }
 0x167   : > { %v1254_v22 = vrot.slane %v1253_v41, 1  ;;  %v1296_v23 = vrot.slane %v1295_v21, 1  ;;  %2127 = vmatprep.subr.bf16.mxu0 (!%p1810_p12), %v2348_v36  ;;  %2145 = vmatprep.subr.bf16.mxu1 (!%p1810_p12), %v2348_v36 }
 0x169   : > { %v1255_v25 = vadd.f32 %v1254_v22, %v1253_v41  ;;  %v1297_v28 = vadd.f32 %v1296_v23, %v1295_v21  ;;  %v1829_v41 = vld [vmem:[%s2816_s2 + $0xf8] sm:$0xff] (!%p1810_p12)  ;;  %v1811_v21 = vld [vmem:[%s2817_s3] ss:$0 sm:$0xff] (!%p1810_p12) }
 0x16a   : > { %1315 = sbr.rel (%p1810_p12) target bundleno = 1129 (0x469), region = 85  ;;  %2129 = vmatpush3.bf16.msra.mxu0 (!%p1810_p12), %v2128_v54  ;;  %2147 = vmatpush3.bf16.msra.mxu1 (!%p1810_p12), %v2146_v10  ;;  %v2158_v20 = vpack.c.bf16 (!%p1810_p12), %v1829_v41, %v1828_v19  ;;  %v1833_v54 = vld [vmem:[%s2816_s2 + $0x100] sm:$0xff] (!%p1810_p12)  ;;  %v2179_v10 = vpack.c.bf16 (!%p1810_p12), %v1846_v9, %v1845_v8 }
 0x16b   : > { %v1304_v27 = vsel %vm1303_vm3, %v1255_v25, %v1234_v24  ;;  %2130 = vmatprep.subr.bf16.mxu0 (!%p1810_p12), %v2348_v36  ;;  %2148 = vmatprep.subr.bf16.mxu1 (!%p1810_p12), %v2348_v36  ;;  %v2161_v56 = vpack.c.bf16 (!%p1810_p12), %v1834_v55, %v1833_v54 }
 0x16c   : > { %v1306_v30 = vsel %vm1305_vm4, %v1276_v26, %v1304_v27 }
 0x16d   : > { %v1308_v31 = vsel %vm1307_vm5, %v1297_v28, %v1306_v30 }
 0x16e   : > { %v1310_v32 = vadd.f32 %v1308_v31, %v1298_v29  ;;  %2132 = vmatpush3.bf16.msra.mxu0 (!%p1810_p12), %v2131_v57  ;;  %2150 = vmatpush3.bf16.msra.mxu1 (!%p1810_p12), %v2149_v13  ;;  %v1835_v57 = vld [vmem:[%s2816_s2 + $0x110] sm:$0xff] (!%p1810_p12)  ;;  %v2182_v13 = vpack.c.bf16 (!%p1810_p12), %v1848_v12, %v1847_v11 }
 0x16f   : > { %2133 = vmatprep.subr.bf16.mxu0 (!%p1810_p12), %v2348_v36  ;;  %2151 = vmatprep.subr.bf16.mxu1 (!%p1810_p12), %v2348_v36  ;;  %v2164_v59 = vpack.c.bf16 (!%p1810_p12), %v1836_v58, %v1835_v57 }
 0x170   : > { %1311 = vst [vmem:[#allocation2] sm:$0xf] %v1310_v32 }
 0x172   : > { %2135 = vmatpush3.bf16.msra.mxu0 %v2134_v60  ;;  %2153 = vmatpush3.bf16.msra.mxu1 %v2152_v16  ;;  %v1837_v60 = vld [vmem:[%s2816_s2 + $0x120] sm:$0xff] }
 0x173   : > { %2160 = vmatprep.subr.bf16.mxu0 %v2348_v36  ;;  %2154 = vmatprep.subr.bf16.mxu1 %v2348_v36 }
 0x176   : > { %2156 = vmatpush3.bf16.msra.mxu1 %v2155_v18 }
 0x177   : > { %v1316_v61 = vld [vmem:[#allocation2] sm:$0xff]  ;;  %2157 = vmatprep.subr.bf16.mxu1 %v2348_v36 }
 0x178   : > { %v1317_v62 = vmul.f32 0.00390625, %v1316_v61  ;;  %v1838_v61 = vld [vmem:[%s2816_s2 + $0x128] sm:$0xff] }
 0x17a   : > { %2040 = vmatmul.mubr.f32.vlgmr.msra.gmra.mrb[0].mxu0 %v1317_v62  ;;  %2159 = vmatpush3.bf16.msra.mxu1 %v2158_v20  ;;  %v2167_v62 = vpack.c.bf16 %v1838_v61, %v1837_v60 }
 0x17b   : > { %2109 = vmatprep.mubr.msk.f32.mxu0 %vm2349_vm6, %v2350_v39  ;;  %2162 = vmatpush3.bf16.msra.mxu0 %v2161_v56 }
 0x17c   : > { %2163 = vmatprep.subr.bf16.mxu0 %v2348_v36 }
 0x17f   : > { %2165 = vmatpush3.bf16.msra.mxu0 %v2164_v59 }
 0x180   : > { %2166 = vmatprep.subr.bf16.mxu0 %v2348_v36 }
 0x183   : > { %2168 = vmatpush3.bf16.msra.mxu0 %v2167_v62 }
 0x184   : > { %2169 = vmatprep.subr.bf16.mxu0 %v2348_v36 }
 0x187   : > { %2171 = vmatpush3.bf16.msra.mxu0 %v2170_v1 }
 0x188   : > { %2172 = vmatprep.subr.bf16.mxu0 %v2348_v36 }
 0x18b   : > { %2174 = vmatpush3.bf16.msra.mxu0 %v2173_v4 }
 0x18c   : > { %2175 = vmatprep.subr.bf16.mxu0 %v2348_v36 }
 0x18f   : > { %2177 = vmatpush3.bf16.msra.mxu0 %v2176_v7 }
 0x190   : > { %2178 = vmatprep.subr.bf16.mxu0 %v2348_v36 }
 0x193   : > { %2180 = vmatpush3.bf16.msra.mxu0 %v2179_v10 }
 0x194   : > { %2181 = vmatprep.subr.bf16.mxu0 %v2348_v36 }
 0x197   : > { %2183 = vmatpush3.bf16.msra.mxu0 %v2182_v13 }
 0x24d   : > { %v1407_v22 = vpop.f32.mrb[0].mxu0 }
 0x24e   : > { %v1408_v23 = vadd.f32 %v1811_v21, %v1407_v22  ;;  %v2041_v24 = vpop.f32.mrb[1].mxu0 }
 0x250   : > { %v1412_v25 = vsel %vm1411_vm7, %v1408_v23, 0.0 }
 0x251   : > { %v1413_v26 = vrot.slane %v1412_v25, 4 }
 0x253   : > { %v1414_v27 = vadd.f32 %v1413_v26, %v1412_v25 }
 0x255   : > { %v1415_v28 = vrot.slane %v1414_v27, 2 }
 0x257   : > { %v1416_v29 = vadd.f32 %v1415_v28, %v1414_v27 }
 0x259   : > { %v1417_v30 = vrot.slane %v1416_v29, 1 }
 0x25b   : > { %v1418_v31 = vadd.f32 %v1417_v30, %v1416_v29 }
 0x25d   : > { %v1419_v32 = vmul.f32 0.25, %v1418_v31 }
 0x25f   : > { %v1420_v33 = vsub.f32 %v1408_v23, %v1419_v32 }
 0x261   : > { %v1421_v34 = vmul.f32 %v1420_v33, %v1420_v33 }
 0x263   : > { %v1422_v35 = vsel %vm1411_vm7, %v1421_v34, 0.0 }
 0x264   : > { %v1423_v37 = vrot.slane %v1422_v35, 4 }
 0x266   : > { %v1424_v38 = vadd.f32 %v1423_v37, %v1422_v35  ;;  %v1831_v35 = vld [vmem:[%s2817_s3 + $0x4] ss:$0 sm:$0xff] }
 0x268   : > { %v1425_v39 = vrot.slane %v1424_v38, 2 }
 0x26a   : > { %v1426_v42 = vadd.f32 %v1425_v39, %v1424_v38  ;;  %v1832_v38 = vld [vmem:[%s2817_s3 + $0x5] ss:$0 sm:$0xff] }
 0x26c   : > { %v1427_v43 = vrot.slane %v1426_v42, 1 }
 0x26e   : > { %v1428_v44 = vadd.f32 %v1427_v43, %v1426_v42 }
 0x270   : > { %v1429_v45 = vmul.f32 0.25, %v1428_v44 }
 0x272   : > { %v1430_v46 = vadd.f32 1e-05, %v1429_v45 }
 0x274   : > { %2286 = vrsqrt.f32 %v1430_v46 }
 0x27e   : > { %v2287_v47 = vpop.eup %2286 }
 0x27f   : > { %v1432_v49 = vmul.f32 %v2287_v47, %v1420_v33 }
 0x281   : > { %v1437_v51 = vmul.f32 %v1812_v48, %v1432_v49 }
 0x283   : > { %v1442_v52 = vadd.f32 %v1813_v50, %v1437_v51 }
 0x285   : > { %v1443_v53 = vmax.f32 %v1442_v52, 0.0 }
 0x287   : > { %2075 = vmatmul.mubr.f32.vlgmr.msra.gmra.mrb[0].mxu1 %v1443_v53 }
 0x35a   : > { %v1534_v15 = vpop.f32.mrb[0].mxu1 }
 0x35b   : > { %v1535_v16 = vadd.f32 %v1830_v14, %v1534_v15  ;;  %v2076_v40 = vpop.f32.mrb[1].mxu1 }
 0x35d   : > { %v1538_v17 = vsel %vm1411_vm7, %v1535_v16, 0.0 }
 0x35e   : > { %v1539_v36 = vrot.slane %v1538_v17, 4 }
 0x360   : > { %v1540_v18 = vadd.f32 %v1539_v36, %v1538_v17 }
 0x362   : > { %v1541_v19 = vrot.slane %v1540_v18, 2 }
 0x364   : > { %v1542_v41 = vadd.f32 %v1541_v19, %v1540_v18 }
 0x366   : > { %v1543_v20 = vrot.slane %v1542_v41, 1 }
 0x368   : > { %v1544_v21 = vadd.f32 %v1543_v20, %v1542_v41 }
 0x36a   : > { %v1545_v22 = vmul.f32 0.25, %v1544_v21 }
 0x36c   : > { %v1546_v23 = vsub.f32 %v1535_v16, %v1545_v22 }
 0x36e   : > { %v1547_v24 = vmul.f32 %v1546_v23, %v1546_v23 }
 0x370   : > { %v1548_v25 = vsel %vm1411_vm7, %v1547_v24, 0.0 }
 0x371   : > { %v1549_v26 = vrot.slane %v1548_v25, 4 }
 0x373   : > { %v1550_v27 = vadd.f32 %v1549_v26, %v1548_v25 }
 0x375   : > { %v1551_v28 = vrot.slane %v1550_v27, 2 }
 0x377   : > { %v1552_v29 = vadd.f32 %v1551_v28, %v1550_v27 }
 0x379   : > { %v1553_v30 = vrot.slane %v1552_v29, 1 }
 0x37b   : > { %v1554_v31 = vadd.f32 %v1553_v30, %v1552_v29 }
 0x37d   : > { %v1555_v32 = vmul.f32 0.25, %v1554_v31 }
 0x37f   : > { %v1556_v33 = vadd.f32 1e-05, %v1555_v32 }
 0x381   : > { %2288 = vrsqrt.f32 %v1556_v33 }
 0x38b   : > { %v2289_v34 = vpop.eup %2288 }
 0x38c   : > { %v1558_v37 = vmul.f32 %v2289_v34, %v1546_v23 }
 0x38e   : > { %v1563_v39 = vmul.f32 %v1831_v35, %v1558_v37 }
 0x390   : > { %v1568_v42 = vadd.f32 %v1832_v38, %v1563_v39 }
 0x392   : > { %v1569_v43 = vmax.f32 %v1568_v42, 0.0 }
 0x394   : > { %2110 = vmatmul.mubr.f32.vlgmr.msra.gmra.mrb[2].mxu0 %v1569_v43 }
 0x467   : > { %v1653_v44 = vpop.f32.mrb[2].mxu0 }
 0x468   : > { %1657 = vst [vmem:[%s2512_s27] sm:$0xff] %v1653_v44  ;;  %v2111_v45 = vpop.f32.mrb[3].mxu0 }
 0x469 PF: > { %s14_s21 = sadd.s32 1, %s2344_s21   ;;  %s2819_s15 = smov %s2324_s16 }
 0x46a   : > { %p11_p13 = scmp.ge.s32.totalorder %s14_s21, 6   ;;  %s2820_s16 = smov %s2427_s28 }
 0x46b   : > { %s2821_s17 = smov %s2336_s19  ;;  %s2822_s18 = smov %s2340_s20 }
 0x46c   : > { %s2823_s19 = smov %s2826_s22  ;;  %s2824_s20 = smov %s2830_s23 }
 0x46d   :  { %13 = sbr.rel (!%p11_p13) target bundleno = 4 (0x4), region = 122 }

</bundles_post_ra>
